<compile_context>
chip_gen: v5e
topology: v5e:2x2
jax: 0.10.0
libtpu: 0.0.40
codegen_flags: <defaults>
</compile_context>

<pallas_src>
import math
import numpy as np
import jax
import jax.numpy as jnp
from jax.experimental import pallas as pl
from jax.experimental.pallas import tpu as pltpu


def _swish(x):
    return x * (1.0 / (1.0 + jnp.exp(-x)))


# ---------------------------------------------------------------------------
# Kernels
# ---------------------------------------------------------------------------
def _make_stage1_kernel(nb, pre_act):
    # x_ref: (nb, Cin, L); s*/t*: per-channel scale/shift columns; w1_ref: (mid, Cin)
    def kernel(x_ref, s1_ref, t1_ref, w1_ref, s2_ref, t2_ref, o_ref):
        w1 = w1_ref[...]
        s2 = s2_ref[...]
        t2 = t2_ref[...]
        if pre_act:
            s1 = s1_ref[...]
            t1 = t1_ref[...]
        for i in range(nb):
            xb = x_ref[i]                                            # (Cin, L)
            if pre_act:
                xb = _swish(s1 * xb + t1)                            # bn1 + swish
            y = jnp.dot(w1, xb, preferred_element_type=jnp.float32)  # conv1 (1x1)
            o_ref[i] = _swish(s2 * y + t2).astype(o_ref.dtype)       # bn2(+bias) + swish
    return kernel


def _make_stage2_kernel(nb, K, stride, groups, cin_g, cout_g, l_out):
    # x_ref: (nb, stride, Cin2, Lq) phase-split padded input
    # w_ref: (groups, cout_g, K*cin_g) fused-tap weights; s3/t3: (Cin2, 1)
    def kernel(x_ref, w_ref, s3_ref, t3_ref, o_ref):
        for i in range(nb):
            for g in range(groups):
                c0 = g * cin_g
                # im2col: K shifted phase slices stacked along the contraction axis so
                # each group is ONE MXU matmul of depth K*cin_g (instead of K shallow dots).
                taps = [x_ref[i, k % stride, c0:c0 + cin_g,
                              (k // stride):(k // stride) + l_out] for k in range(K)]
                slab = taps[0] if K == 1 else jnp.concatenate(taps, axis=0)   # (K*cin_g, l_out)
                y = jnp.dot(w_ref[g], slab, preferred_element_type=jnp.float32)
                o0 = g * cout_g
                s3 = s3_ref[o0:o0 + cout_g, :]
                t3 = t3_ref[o0:o0 + cout_g, :]
                o_ref[i, o0:o0 + cout_g, :] = _swish(s3 * y + t3).astype(o_ref.dtype)
    return kernel


def _make_stage3_kernel(nb, cout, l_out):
    inv_l = 1.0 / float(l_out)

    def kernel(g_ref, id_ref, w3_ref, b3_ref, wf1_ref, bf1_ref, wf2_ref, bf2_ref, o_ref):
        w3 = w3_ref[...]
        b3 = b3_ref[...]
        wf1 = wf1_ref[...]
        bf1 = bf1_ref[...]
        wf2 = wf2_ref[...]
        bf2 = bf2_ref[...]
        for i in range(nb):
            h = g_ref[i]                                                       # (mid, L_out)
            y = jnp.dot(w3, h, preferred_element_type=jnp.float32) + b3        # conv3 (1x1)
            # Squeeze-Excite: per-channel mean, 2-layer MLP, sigmoid gate.
            # The SE "vector" is lane-broadcast to one MXU tile width (128) so both FCs are
            # ordinary lane-dense matmuls (no (C,1) mat-vec, no in-kernel transposes).
            se = jnp.sum(y, axis=-1, keepdims=True) * inv_l                    # (Cout, 1)
            se_b = jnp.broadcast_to(se, (cout, 128))
            z1 = _swish(jnp.dot(wf1, se_b, preferred_element_type=jnp.float32) + bf1)
            z2 = jnp.dot(wf2, z1, preferred_element_type=jnp.float32) + bf2
            gate = (1.0 / (1.0 + jnp.exp(-z2)))[:, 0:1]                        # (Cout, 1)
            o_ref[i] = (y * gate + id_ref[i]).astype(o_ref.dtype)              # gate + residual
    return kernel


# ---------------------------------------------------------------------------
# Wrapper
# ---------------------------------------------------------------------------
def _bn_affine(gamma, beta, mean, var, eps):
    s = gamma / jnp.sqrt(var + eps)
    return s, beta - mean * s


def _col(v):
    return v.reshape(-1, 1).astype(jnp.float32)


def _pick_batch_block(n, bytes_per_sample, budget_bytes=8 * 1024 * 1024):
    """Largest divisor of n whose double-buffered per-step footprint fits the budget
    (conservative for v7x's 64 MiB physical / 32 MiB default scoped VMEM)."""
    nb = 1
    for cand in range(1, n + 1):
        if n % cand == 0 and 2 * cand * bytes_per_sample <= budget_bytes:
            nb = cand
    return nb


def basic_block_forward(x, params, *, kernel_size, stride, groups, downsample,
                        is_first_block=False, use_bn=True, nb=None, bn_eps=1e-5):
    N, Cin, L = x.shape
    w1, b1 = params["conv1_w"], params["conv1_b"]
    w2, b2 = params["conv2_w"], params["conv2_b"]
    w3, b3 = params["conv3_w"], params["conv3_b"]
    mid = w1.shape[0]
    Cout = w3.shape[0]
    half = params["se_fc1_w"].shape[0]
    K = kernel_size
    eff_stride = stride if downsample else 1
    x = x.astype(jnp.float32)

    # Fold eval-mode BN into scale/shift; fold conv biases into the following BN shift.
    if use_bn:
        s1, t1 = _bn_affine(params["bn1_g"], params["bn1_b"], params["bn1_m"], params["bn1_v"], bn_eps)
        s2, t2 = _bn_affine(params["bn2_g"], params["bn2_b"], params["bn2_m"], params["bn2_v"], bn_eps)
        s3, t3 = _bn_affine(params["bn3_g"], params["bn3_b"], params["bn3_m"], params["bn3_v"], bn_eps)
    else:
        s1, t1 = jnp.ones((Cin,), jnp.float32), jnp.zeros((Cin,), jnp.float32)
        s2, t2 = jnp.ones((mid,), jnp.float32), jnp.zeros((mid,), jnp.float32)
        s3, t3 = jnp.ones((mid,), jnp.float32), jnp.zeros((mid,), jnp.float32)
    t2 = t2 + s2 * b1
    t3 = t3 + s3 * b2

    # conv2 geometry ("same" pad) + stride phase split + fused-tap weight layout.
    L_out = -(-L // eff_stride)
    p = max(0, (L_out - 1) * eff_stride + K - L)
    left = p // 2
    right = p - left
    Lq = -(-(L + p) // eff_stride)
    extra = Lq * eff_stride - (L + p)

    cin_g = mid // groups
    cout_g = mid // groups
    w2g = (w2.reshape(groups, cout_g, cin_g, K)
             .transpose(0, 1, 3, 2)
             .reshape(groups, cout_g, K * cin_g).astype(jnp.float32))

    # Batch blocking sized to a conservative VMEM budget.
    bytes_per_sample = 4 * (Cin * L + mid * L + eff_stride * mid * Lq
                            + mid * L_out + 2 * Cout * L_out)
    if nb is None:
        nb = _pick_batch_block(N, bytes_per_sample)
    assert N % nb == 0, "batch block must divide batch"
    grid = (N // nb,)
    cparams = pltpu.CompilerParams(dimension_semantics=("parallel",))

    # ---- stage 1 ----
    h = pl.pallas_call(
        _make_stage1_kernel(nb, pre_act=not is_first_block),
        out_shape=jax.ShapeDtypeStruct((N, mid, L), jnp.float32),
        grid_spec=pltpu.PrefetchScalarGridSpec(
            num_scalar_prefetch=0, grid=grid,
            in_specs=[
                pl.BlockSpec((nb, Cin, L), lambda n: (n, 0, 0)),
                pl.BlockSpec((Cin, 1), lambda n: (0, 0)),
                pl.BlockSpec((Cin, 1), lambda n: (0, 0)),
                pl.BlockSpec((mid, Cin), lambda n: (0, 0)),
                pl.BlockSpec((mid, 1), lambda n: (0, 0)),
                pl.BlockSpec((mid, 1), lambda n: (0, 0)),
            ],
            out_specs=pl.BlockSpec((nb, mid, L), lambda n: (n, 0, 0)),
        ),
        compiler_params=cparams,
    )(x, _col(s1), _col(t1), w1[:, :, 0].astype(jnp.float32), _col(s2), _col(t2))

    # Single pad (same-pad + phase-split tail) followed by the phase split (layout glue).
    h_pad = jnp.pad(h, ((0, 0), (0, 0), (left, right + extra)))
    x_ph = h_pad.reshape(N, mid, Lq, eff_stride).transpose(0, 3, 1, 2)     # (N, S, mid, Lq)

    # ---- stage 2 ----
    g_out = pl.pallas_call(
        _make_stage2_kernel(nb, K, eff_stride, groups, cin_g, cout_g, L_out),
        out_shape=jax.ShapeDtypeStruct((N, mid, L_out), jnp.float32),
        grid_spec=pltpu.PrefetchScalarGridSpec(
            num_scalar_prefetch=0, grid=grid,
            in_specs=[
                pl.BlockSpec((nb, eff_stride, mid, Lq), lambda n: (n, 0, 0, 0)),
                pl.BlockSpec((groups, cout_g, K * cin_g), lambda n: (0, 0, 0)),
                pl.BlockSpec((mid, 1), lambda n: (0, 0)),
                pl.BlockSpec((mid, 1), lambda n: (0, 0)),
            ],
            out_specs=pl.BlockSpec((nb, mid, L_out), lambda n: (n, 0, 0)),
        ),
        compiler_params=cparams,
    )(x_ph, w2g, _col(s3), _col(t3))

    # ---- identity path: "same" max-pool (pool kernel = stride) + channel zero-pad ----
    identity = x
    if downsample:
        pp = eff_stride - 1
        lp = pp // 2
        rp = pp - lp
        idp = jnp.pad(identity, ((0, 0), (0, 0), (lp, rp)))
        idp = idp[:, :, :L_out * eff_stride]
        identity = jnp.max(idp.reshape(N, Cin, L_out, eff_stride), axis=-1)
    if Cout != Cin:
        ch_diff = Cout - Cin
        lc = ch_diff // 2
        identity = jnp.pad(identity, ((0, 0), (lc, ch_diff - lc), (0, 0)))
    identity = identity.astype(jnp.float32)

    # ---- stage 3 ----
    out = pl.pallas_call(
        _make_stage3_kernel(nb, Cout, L_out),
        out_shape=jax.ShapeDtypeStruct((N, Cout, L_out), jnp.float32),
        grid_spec=pltpu.PrefetchScalarGridSpec(
            num_scalar_prefetch=0, grid=grid,
            in_specs=[
                pl.BlockSpec((nb, mid, L_out), lambda n: (n, 0, 0)),
                pl.BlockSpec((nb, Cout, L_out), lambda n: (n, 0, 0)),
                pl.BlockSpec((Cout, mid), lambda n: (0, 0)),
                pl.BlockSpec((Cout, 1), lambda n: (0, 0)),
                pl.BlockSpec((half, Cout), lambda n: (0, 0)),
                pl.BlockSpec((half, 1), lambda n: (0, 0)),
                pl.BlockSpec((Cout, half), lambda n: (0, 0)),
                pl.BlockSpec((Cout, 1), lambda n: (0, 0)),
            ],
            out_specs=pl.BlockSpec((nb, Cout, L_out), lambda n: (n, 0, 0)),
        ),
        compiler_params=cparams,
    )(g_out, identity, w3[:, :, 0].astype(jnp.float32), _col(b3),
      params["se_fc1_w"].astype(jnp.float32), _col(params["se_fc1_b"]),
      params["se_fc2_w"].astype(jnp.float32), _col(params["se_fc2_b"]))
    return out


# ---------------------------------------------------------------------------
# Pure-JAX reference (same eval-mode semantics) for the correctness check
# ---------------------------------------------------------------------------
def basic_block_reference(x, params, *, kernel_size, stride, groups, downsample,
                          is_first_block=False, use_bn=True, bn_eps=1e-5):
    eff_stride = stride if downsample else 1
    hp = jax.lax.Precision.HIGHEST

    def bn(v, g, b, m, var):
        return (v - m[None, :, None]) / jnp.sqrt(var[None, :, None] + bn_eps) \
            * g[None, :, None] + b[None, :, None]

    def swish(v):
        return v * (1.0 / (1.0 + jnp.exp(-v)))

    def conv_same(v, w, b, s, grp):
        L = v.shape[-1]
        Kk = w.shape[-1]
        out_len = (L + s - 1) // s
        p = max(0, (out_len - 1) * s + Kk - L)
        lf = p // 2
        y = jax.lax.conv_general_dilated(
            v, w, window_strides=(s,), padding=[(lf, p - lf)],
            dimension_numbers=("NCH", "OIH", "NCH"), feature_group_count=grp, precision=hp)
        return y + b[None, :, None]

    out = x
    if not is_first_block:
        if use_bn:
            out = bn(out, params["bn1_g"], params["bn1_b"], params["bn1_m"], params["bn1_v"])
        out = swish(out)
    out = conv_same(out, params["conv1_w"], params["conv1_b"], 1, 1)
    if use_bn:
        out = bn(out, params["bn2_g"], params["bn2_b"], params["bn2_m"], params["bn2_v"])
    out = swish(out)
    out = conv_same(out, params["conv2_w"], params["conv2_b"], eff_stride, groups)
    if use_bn:
        out = bn(out, params["bn3_g"], params["bn3_b"], params["bn3_m"], params["bn3_v"])
    out = swish(out)
    out = conv_same(out, params["conv3_w"], params["conv3_b"], 1, 1)

    se = out.mean(axis=-1)
    se = swish(jnp.dot(se, params["se_fc1_w"].T, precision=hp) + params["se_fc1_b"])
    se = jnp.dot(se, params["se_fc2_w"].T, precision=hp) + params["se_fc2_b"]
    se = 1.0 / (1.0 + jnp.exp(-se))
    out = out * se[:, :, None]

    identity = x
    Cin = x.shape[1]
    Cout = params["conv3_w"].shape[0]
    if downsample:
        pp = eff_stride - 1
        lp = pp // 2
        idp = jnp.pad(identity, ((0, 0), (0, 0), (lp, pp - lp)))
        identity = jax.lax.reduce_window(
            idp, -jnp.inf, jax.lax.max,
            window_dimensions=(1, 1, eff_stride), window_strides=(1, 1, eff_stride),
            padding="VALID")
    if Cout != Cin:
        d = Cout - Cin
        lc = d // 2
        identity = jnp.pad(identity, ((0, 0), (lc, d - lc), (0, 0)))
    return out + identity


if __name__ == "__main__":
    jax.config.update("jax_default_matmul_precision", "highest")

    # Block config (mirrors BasicBlock.__init__)
    in_ch, out_ch, ratio = 16, 32, 0.5
    kernel_size, stride, groups = 5, 2, 2
    downsample, is_first_block, use_bn = True, False, True
    mid = int(out_ch * ratio)        # 16
    half = out_ch // 2               # 16
    N, L = 4, 256                    # L chosen so L_out = 128 (lane-dense outputs)

    key = jax.random.PRNGKey(0)
    ks = jax.random.split(key, 24)
    ki = iter(range(24))
    nk = lambda: ks[next(ki)]
    u = lambda k, shape, bound: jax.random.uniform(k, shape, jnp.float32, -bound, bound)

    bnd1 = 1.0 / math.sqrt(in_ch * 1)
    bnd2 = 1.0 / math.sqrt((mid // groups) * kernel_size)
    bnd3 = 1.0 / math.sqrt(mid * 1)
    bndf1 = 1.0 / math.sqrt(out_ch)
    bndf2 = 1.0 / math.sqrt(half)

    params = {
        "bn1_g": jax.random.uniform(nk(), (in_ch,), jnp.float32, 0.5, 1.5),
        "bn1_b": 0.1 * jax.random.normal(nk(), (in_ch,), jnp.float32),
        "bn1_m": 0.1 * jax.random.normal(nk(), (in_ch,), jnp.float32),
        "bn1_v": jax.random.uniform(nk(), (in_ch,), jnp.float32, 0.5, 1.5),
        "conv1_w": u(nk(), (mid, in_ch, 1), bnd1),
        "conv1_b": u(nk(), (mid,), bnd1),
        "bn2_g": jax.random.uniform(nk(), (mid,), jnp.float32, 0.5, 1.5),
        "bn2_b": 0.1 * jax.random.normal(nk(), (mid,), jnp.float32),
        "bn2_m": 0.1 * jax.random.normal(nk(), (mid,), jnp.float32),
        "bn2_v": jax.random.uniform(nk(), (mid,), jnp.float32, 0.5, 1.5),
        "conv2_w": u(nk(), (mid, mid // groups, kernel_size), bnd2),
        "conv2_b": u(nk(), (mid,), bnd2),
        "bn3_g": jax.random.uniform(nk(), (mid,), jnp.float32, 0.5, 1.5),
        "bn3_b": 0.1 * jax.random.normal(nk(), (mid,), jnp.float32),
        "bn3_m": 0.1 * jax.random.normal(nk(), (mid,), jnp.float32),
        "bn3_v": jax.random.uniform(nk(), (mid,), jnp.float32, 0.5, 1.5),
        "conv3_w": u(nk(), (out_ch, mid, 1), bnd3),
        "conv3_b": u(nk(), (out_ch,), bnd3),
        "se_fc1_w": u(nk(), (half, out_ch), bndf1),
        "se_fc1_b": u(nk(), (half,), bndf1),
        "se_fc2_w": u(nk(), (out_ch, half), bndf2),
        "se_fc2_b": u(nk(), (out_ch,), bndf2),
    }
    x = jax.random.normal(nk(), (N, in_ch, L), jnp.float32)

    out = basic_block_forward(
        x, params, kernel_size=kernel_size, stride=stride, groups=groups,
        downsample=downsample, is_first_block=is_first_block, use_bn=use_bn, nb=2)
    out = jax.block_until_ready(out)

    ref = basic_block_reference(
        x, params, kernel_size=kernel_size, stride=stride, groups=groups,
        downsample=downsample, is_first_block=is_first_block, use_bn=use_bn)
    ref = jax.block_until_ready(ref)

    np.testing.assert_allclose(np.asarray(out), np.asarray(ref), rtol=1e-4, atol=1e-4)
    print("KERNEL_OK")
</pallas_src>

<mosaic_0001>
module attributes {stable_mosaic.version = 11 : i64} {
  func.func @kernel(%arg0: i32, %arg1: memref<2x16x256xf32, #tpu.memory_space<vmem>>, %arg2: memref<16x1xf32, #tpu.memory_space<vmem>>, %arg3: memref<16x1xf32, #tpu.memory_space<vmem>>, %arg4: memref<16x16xf32, #tpu.memory_space<vmem>>, %arg5: memref<16x1xf32, #tpu.memory_space<vmem>>, %arg6: memref<16x1xf32, #tpu.memory_space<vmem>>, %arg7: memref<2x16x256xf32, #tpu.memory_space<vmem>>) attributes {dimension_semantics = [#tpu.dimension_semantics<parallel>], iteration_bounds = array<i64: 2>, scalar_prefetch = 0 : i64, scratch_operands = 0 : i64, tpu.core_type = #tpu.core_type<tc>, window_params = [{transform_indices = @transform_0, window_bounds = array<i64: 2, 16, 256>}, {pipeline_mode = #tpu.pipeline_mode<synchronous>, transform_indices = @transform_1, window_bounds = array<i64: 16, 1>}, {pipeline_mode = #tpu.pipeline_mode<synchronous>, transform_indices = @transform_2, window_bounds = array<i64: 16, 1>}, {pipeline_mode = #tpu.pipeline_mode<synchronous>, transform_indices = @transform_3, window_bounds = array<i64: 16, 16>}, {pipeline_mode = #tpu.pipeline_mode<synchronous>, transform_indices = @transform_4, window_bounds = array<i64: 16, 1>}, {pipeline_mode = #tpu.pipeline_mode<synchronous>, transform_indices = @transform_5, window_bounds = array<i64: 16, 1>}, {transform_indices = @transform_6, window_bounds = array<i64: 2, 16, 256>}]} {
    %c0 = arith.constant 0 : index
    %c0_0 = arith.constant 0 : index
    %0 = vector.load %arg4[%c0, %c0_0] : memref<16x16xf32, #tpu.memory_space<vmem>>, vector<16x16xf32>
    %c0_1 = arith.constant 0 : index
    %c0_2 = arith.constant 0 : index
    %1 = vector.load %arg5[%c0_1, %c0_2] : memref<16x1xf32, #tpu.memory_space<vmem>>, vector<16x1xf32>
    %c0_3 = arith.constant 0 : index
    %c0_4 = arith.constant 0 : index
    %2 = vector.load %arg6[%c0_3, %c0_4] : memref<16x1xf32, #tpu.memory_space<vmem>>, vector<16x1xf32>
    %c0_5 = arith.constant 0 : index
    %c0_6 = arith.constant 0 : index
    %3 = vector.load %arg2[%c0_5, %c0_6] : memref<16x1xf32, #tpu.memory_space<vmem>>, vector<16x1xf32>
    %c0_7 = arith.constant 0 : index
    %c0_8 = arith.constant 0 : index
    %4 = vector.load %arg3[%c0_7, %c0_8] : memref<16x1xf32, #tpu.memory_space<vmem>>, vector<16x1xf32>
    %c0_9 = arith.constant 0 : index
    %c0_10 = arith.constant 0 : index
    %c0_11 = arith.constant 0 : index
    %5 = vector.load %arg1[%c0_9, %c0_10, %c0_11] : memref<2x16x256xf32, #tpu.memory_space<vmem>>, vector<1x16x256xf32>
    %6 = vector.shape_cast %5 : vector<1x16x256xf32> to vector<16x256xf32>
    %7 = vector.broadcast %3 : vector<16x1xf32> to vector<16x256xf32>
    %8 = arith.mulf %7, %6 : vector<16x256xf32>
    %9 = vector.broadcast %4 : vector<16x1xf32> to vector<16x256xf32>
    %10 = arith.addf %8, %9 : vector<16x256xf32>
    %cst = arith.constant 0.000000e+00 : f32
    %11 = vector.broadcast %cst : f32 to vector<16x256xf32>
    %12 = arith.subf %11, %10 : vector<16x256xf32>
    %13 = math.exp %12 : vector<16x256xf32>
    %cst_12 = arith.constant 1.000000e+00 : f32
    %14 = vector.broadcast %cst_12 : f32 to vector<16x256xf32>
    %15 = arith.addf %14, %13 : vector<16x256xf32>
    %cst_13 = arith.constant 1.000000e+00 : f32
    %16 = vector.broadcast %cst_13 : f32 to vector<16x256xf32>
    %17 = arith.divf %16, %15 : vector<16x256xf32>
    %18 = arith.mulf %10, %17 : vector<16x256xf32>
    %cst_14 = arith.constant dense<0.000000e+00> : vector<16x256xf32>
    %19 = tpu.matmul %0, %18, %cst_14 {dimension_numbers = #tpu.dot_dimension_numbers<[1], [0], [0], [1], [0, 0, 1, 1], [], []>, precision = #tpu.contract_precision<fp32>} : vector<16x16xf32>, vector<16x256xf32>, vector<16x256xf32> -> vector<16x256xf32>
    %20 = vector.broadcast %1 : vector<16x1xf32> to vector<16x256xf32>
    %21 = arith.mulf %20, %19 : vector<16x256xf32>
    %22 = vector.broadcast %2 : vector<16x1xf32> to vector<16x256xf32>
    %23 = arith.addf %21, %22 : vector<16x256xf32>
    %cst_15 = arith.constant 0.000000e+00 : f32
    %24 = vector.broadcast %cst_15 : f32 to vector<16x256xf32>
    %25 = arith.subf %24, %23 : vector<16x256xf32>
    %26 = math.exp %25 : vector<16x256xf32>
    %cst_16 = arith.constant 1.000000e+00 : f32
    %27 = vector.broadcast %cst_16 : f32 to vector<16x256xf32>
    %28 = arith.addf %27, %26 : vector<16x256xf32>
    %cst_17 = arith.constant 1.000000e+00 : f32
    %29 = vector.broadcast %cst_17 : f32 to vector<16x256xf32>
    %30 = arith.divf %29, %28 : vector<16x256xf32>
    %31 = arith.mulf %23, %30 : vector<16x256xf32>
    %c0_18 = arith.constant 0 : index
    %c0_19 = arith.constant 0 : index
    %c0_20 = arith.constant 0 : index
    %32 = vector.load %arg7[%c0_18, %c0_19, %c0_20] : memref<2x16x256xf32, #tpu.memory_space<vmem>>, vector<1x16x256xf32>
    %33 = vector.shape_cast %32 : vector<1x16x256xf32> to vector<16x256xf32>
    %34 = vector.shape_cast %31 : vector<16x256xf32> to vector<1x16x256xf32>
    tpu.vector_store %arg7[%c0_18, %c0_19, %c0_20], %34 {strides = array<i32>} : memref<2x16x256xf32, #tpu.memory_space<vmem>>, vector<1x16x256xf32>,
    %c1 = arith.constant 1 : index
    %c0_21 = arith.constant 0 : index
    %c0_22 = arith.constant 0 : index
    %35 = vector.load %arg1[%c1, %c0_21, %c0_22] : memref<2x16x256xf32, #tpu.memory_space<vmem>>, vector<1x16x256xf32>
    %36 = vector.shape_cast %35 : vector<1x16x256xf32> to vector<16x256xf32>
    %37 = vector.broadcast %3 : vector<16x1xf32> to vector<16x256xf32>
    %38 = arith.mulf %37, %36 : vector<16x256xf32>
    %39 = vector.broadcast %4 : vector<16x1xf32> to vector<16x256xf32>
    %40 = arith.addf %38, %39 : vector<16x256xf32>
    %cst_23 = arith.constant 0.000000e+00 : f32
    %41 = vector.broadcast %cst_23 : f32 to vector<16x256xf32>
    %42 = arith.subf %41, %40 : vector<16x256xf32>
    %43 = math.exp %42 : vector<16x256xf32>
    %cst_24 = arith.constant 1.000000e+00 : f32
    %44 = vector.broadcast %cst_24 : f32 to vector<16x256xf32>
    %45 = arith.addf %44, %43 : vector<16x256xf32>
    %cst_25 = arith.constant 1.000000e+00 : f32
    %46 = vector.broadcast %cst_25 : f32 to vector<16x256xf32>
    %47 = arith.divf %46, %45 : vector<16x256xf32>
    %48 = arith.mulf %40, %47 : vector<16x256xf32>
    %cst_26 = arith.constant dense<0.000000e+00> : vector<16x256xf32>
    %49 = tpu.matmul %0, %48, %cst_26 {dimension_numbers = #tpu.dot_dimension_numbers<[1], [0], [0], [1], [0, 0, 1, 1], [], []>, precision = #tpu.contract_precision<fp32>} : vector<16x16xf32>, vector<16x256xf32>, vector<16x256xf32> -> vector<16x256xf32>
    %50 = vector.broadcast %1 : vector<16x1xf32> to vector<16x256xf32>
    %51 = arith.mulf %50, %49 : vector<16x256xf32>
    %52 = vector.broadcast %2 : vector<16x1xf32> to vector<16x256xf32>
    %53 = arith.addf %51, %52 : vector<16x256xf32>
    %cst_27 = arith.constant 0.000000e+00 : f32
    %54 = vector.broadcast %cst_27 : f32 to vector<16x256xf32>
    %55 = arith.subf %54, %53 : vector<16x256xf32>
    %56 = math.exp %55 : vector<16x256xf32>
    %cst_28 = arith.constant 1.000000e+00 : f32
    %57 = vector.broadcast %cst_28 : f32 to vector<16x256xf32>
    %58 = arith.addf %57, %56 : vector<16x256xf32>
    %cst_29 = arith.constant 1.000000e+00 : f32
    %59 = vector.broadcast %cst_29 : f32 to vector<16x256xf32>
    %60 = arith.divf %59, %58 : vector<16x256xf32>
    %61 = arith.mulf %53, %60 : vector<16x256xf32>
    %c1_30 = arith.constant 1 : index
    %c0_31 = arith.constant 0 : index
    %c0_32 = arith.constant 0 : index
    %62 = vector.load %arg7[%c1_30, %c0_31, %c0_32] : memref<2x16x256xf32, #tpu.memory_space<vmem>>, vector<1x16x256xf32>
    %63 = vector.shape_cast %62 : vector<1x16x256xf32> to vector<16x256xf32>
    %64 = vector.shape_cast %61 : vector<16x256xf32> to vector<1x16x256xf32>
    tpu.vector_store %arg7[%c1_30, %c0_31, %c0_32], %64 {strides = array<i32>} : memref<2x16x256xf32, #tpu.memory_space<vmem>>, vector<1x16x256xf32>,
    return
  }
  func.func @transform_0(%arg0: i32) -> (i32, i32, i32) {
    %c0_i32 = arith.constant 0 : i32
    %c0_i32_0 = arith.constant 0 : i32
    %c0_i32_1 = arith.constant 0 : i32
    return %arg0, %c0_i32, %c0_i32_0 : i32, i32, i32
  }
  func.func @transform_1(%arg0: i32) -> (i32, i32) {
    %c0_i32 = arith.constant 0 : i32
    %c0_i32_0 = arith.constant 0 : i32
    %c0_i32_1 = arith.constant 0 : i32
    return %c0_i32, %c0_i32_0 : i32, i32
  }
  func.func @transform_2(%arg0: i32) -> (i32, i32) {
    %c0_i32 = arith.constant 0 : i32
    %c0_i32_0 = arith.constant 0 : i32
    %c0_i32_1 = arith.constant 0 : i32
    return %c0_i32, %c0_i32_0 : i32, i32
  }
  func.func @transform_3(%arg0: i32) -> (i32, i32) {
    %c0_i32 = arith.constant 0 : i32
    %c0_i32_0 = arith.constant 0 : i32
    %c0_i32_1 = arith.constant 0 : i32
    return %c0_i32, %c0_i32_0 : i32, i32
  }
  func.func @transform_4(%arg0: i32) -> (i32, i32) {
    %c0_i32 = arith.constant 0 : i32
    %c0_i32_0 = arith.constant 0 : i32
    %c0_i32_1 = arith.constant 0 : i32
    return %c0_i32, %c0_i32_0 : i32, i32
  }
  func.func @transform_5(%arg0: i32) -> (i32, i32) {
    %c0_i32 = arith.constant 0 : i32
    %c0_i32_0 = arith.constant 0 : i32
    %c0_i32_1 = arith.constant 0 : i32
    return %c0_i32, %c0_i32_0 : i32, i32
  }
  func.func @transform_6(%arg0: i32) -> (i32, i32, i32) {
    %c0_i32 = arith.constant 0 : i32
    %c0_i32_0 = arith.constant 0 : i32
    %c0_i32_1 = arith.constant 0 : i32
    return %arg0, %c0_i32, %c0_i32_0 : i32, i32, i32
  }
}

</mosaic_0001>

<bundles_post_ra>
// kernel: tpu_custom_call.1
= control target key start
LH: loop header
LB: loop body
LE: loop exit
PB: predicated region body
PF: predicated region fallthrough
CT: control target
= control target key end

     0   :  { %11 = vsyncpa [#allocation3], 0  ;;  %s2358_s0 = inlined_call_operand.hbm [shape: f32[4,16,256], index: 0, kind: input, shape index: {}]   ;;  %s2359_s1 = inlined_call_operand.vmem [shape: f32[16,1], index: 1, kind: input, shape index: {}]   ;;  %s2360_s2 = inlined_call_operand.vmem [shape: f32[16,1], index: 2, kind: input, shape index: {}]   ;;  %s2361_s3 = inlined_call_operand.vmem [shape: f32[16,16], index: 3, kind: input, shape index: {}]   ;;  %s2362_s4 = inlined_call_operand.vmem [shape: f32[16,1], index: 4, kind: input, shape index: {}]   ;;  %s2363_s5 = inlined_call_operand.vmem [shape: f32[16,1], index: 5, kind: input, shape index: {}]   ;;  %s2364_s6 = inlined_call_operand.hbm [shape: f32[4,16,256], index: 6, kind: output, shape index: {}]  }
   0x1   :  { %13 = vsyncpa [#allocation3 + $0x1], 0 }
   0x2   :  { %14 = vsyncpa [#allocation4], 0 }
   0x3   :  { %16 = vsyncpa [#allocation4 + $0x1], 0  ;;  %s1836_s21 = smov 0   ;;  %s1838_s22 = smov 0  }
   0x4   :  { %s1840_s23 = smov 0   ;;  %s1842_s24 = smov 0  }
   0x5 LB: > { %s1857_s25 = sadd.s32 4294967295, %s1794_s24   ;;  %s1552_s26 = sadd.s32 4294967294, %s1794_s24   ;;  %s1794_s24 = sphi %s1842_s24, %s2386_s24   ;;  %s1790_s23 = sphi %s1840_s23, %s2385_s23   ;;  %s1786_s22 = sphi %s1838_s22, %s2384_s22   ;;  %s1782_s21 = sphi %s1836_s21, %s2383_s21  }
   0x6   : > { %s1861_s27 = sadd.s32 1, %s1794_s24   ;;  %s29_s28 = sadd.s32 1, %s1790_s23 }
   0x7   : > { %s26_s29 = ssub.s32 %s1794_s24, %s1861_s27  ;;  %p36_p0 = scmp.ne.s32.totalorder %s1790_s23, %s1786_s22 }
   0x8   : > { %p27_p1 = scmp.eq.s32.totalorder %s26_s29, 0  ;;  %p37_p2 = scmp.eq.s32.totalorder %s1794_s24, 0 }
   0x9   : > { %p42_p3 = scmp.ne.s32.totalorder %s1786_s22, %s1782_s21  ;;  %p43_p4 = scmp.eq.s32.totalorder %s1857_s25, 0 }
   0xa   : > { %s1873_s30 = scalar_select %p27_p1, %s1790_s23, %s29_s28  }
   0xb   : > { %p1875_p5 = por %p37_p2, %p36_p0  ;;  %p1879_p6 = por %p43_p4, %p42_p3 }
   0xc   : > { %p171_p7 = scmp.eq.s32.totalorder %s1857_s25, 1  ;;  %p177_p8 = scmp.eq.s32.totalorder %s1552_s26, 1 }
   0xd   : > { %p1592_p10 = scmp.lt.s32.totalorder %s1794_s24, 2  ;;  %s212_s11 = sand.u32 1, %s1790_s23  }
   0xe   : > { %p1886_p11 = por %p171_p7, %p36_p0  ;;  %p1890_p12 = por %p177_p8, %p42_p3 }
   0xf   : > { %s1577_s12 = sshll.u32 %s1794_s24, 6  ;;  %s1555_s13 = sshll.u32 %s212_s11, 6 }
  0x10   : > { %s222_s16 = scalar_lea.hbm %s2358_s0, %s1577_s12  ;;  %s216_s18 = scalar_lea.vmem [#allocation2], %s1555_s13 }
  0x11   : > { %s223_s17 = sshll.u32 %s222_s16, 4  ;;  %s225_s19 = sshll.u32 %s216_s18, 4  ;;  %s224_s17 = int_to_ptr.hbm [resolvable:$true] %s223_s17  ;;  %s226_s19 = int_to_ptr.vmem [resolvable:$true] %s225_s19 }
  0x12   : > { %p1901_p13 = pnand %p1592_p10, %p1875_p5  ;;  %p1559_p0 = scmp.ge.s32.totalorder %s1794_s24, 1 }
  0x13   : > { %p233_p1 = scmp.lt.s32.totalorder %s1794_s24, 3  ;;  %s213_s26 = scalar_lea.sflag [#allocation3], %s212_s11 }
  0x14   : > { %s1698_s28 = sshra.s32 %s224_s17, 4  ;;  %p1702_p3 = pneg %p1901_p13  ;;  %s1699_s28 = int_to_ptr.hbm [resolvable:$true] %s1698_s28 }
  0x15   : > { %s1700_s29 = scalar_lea.hbm %s1699_s28, 64  ;;  %s1705_s7 = scalar_lea.hbm %s2358_s0, 128 }
  0x16   : > { %p1701_p2 = scmp.ne.s32.totalorder %s1699_s28, %s1700_s29  ;;  %p1706_p5 = scmp.lt.s32.totalorder %s1699_s28, %s2358_s0 }
  0x17   : > { %p1707_p8 = scmp.lt.s32.totalorder %s1705_s7, %s1700_s29 }
  0x18   : > { %p1703_p4 = pnand %p1702_p3, %p1701_p2 }
  0x19   : > { %p1708_p10 = por %p1707_p8, %p1706_p5 }
  0x1a   : > { %p1704_p7 = pneg %p1703_p4 }
  0x1c   : > { %p1709_p9 = pnand %p1708_p10, %p1704_p7 }
  0x1e   : > { %1712 = shalt.err (!%p1709_p9)
}
  0x1f   : > { %s1796_s11 = smov 256   ;;  %s1797_s16 = smov 16  }
  0x20   : > { %1587 = dma.hbm_to_vmem [thread:$0]  (!%p1901_p13), %s224_s17, 1024, %s226_s19, %s213_s26, %s1796_s11, %s1796_s11, %s1797_s16  }
  0x21   : > { %p234_p2 = pnand %p1559_p0, %p233_p1 }
  0x22   : > { %s1922_s18 = sand.u32 (!%p234_p2), 1, %s1786_s22  }
  0x23   : > { %237 = sbr.rel (%p234_p2) target bundleno = 475 (0x1db), region = 44  ;;  %s1560_s28 = sshll.u32 (!%p234_p2), %s1922_s18, 6 }
  0x24   : > { %s240_s29 = scalar_lea.sflag (!%p234_p2), [#allocation3], %s1922_s18  ;;  %s1928_s12 = scalar_lea.vmem (!%p234_p2), [#allocation2], %s1560_s28 }
  0x28   : > { %1773 = dma.done.wait (%p1879_p6), %s240_s29, 1024  }
  0x29   : > { %1775 = vsyncadd (%p1879_p6), %s240_s29, 4294966272  ;;  %v1798_v0 = vmov 0   ;;  %v284_v1 = vld [vmem:[%s2360_s2 + $0x8] sm:$0xff]  ;;  %v283_v3 = vld [vmem:[%s2360_s2] sm:$0xff]  ;;  %vm397_vm0 = vcmask 130048   ;;  %s2287_s14 = scalar_lea.vmem [#allocation5], %s1560_s28 }
  0x2a   : > { %1632 = vset.pattern.permute.xlu1 %v1798_v0  ;;  %1631 = vset.pattern.permute.xlu0 %v1798_v0  ;;  %v282_v2 = vld [vmem:[%s2359_s1 + $0x8] sm:$0xff]  ;;  %v281_v4 = vld [vmem:[%s2359_s1] sm:$0xff]  ;;  %v287_v7 = vld [vmem:[%s1928_s12 + $0x10] sm:$0xff]  ;;  %s1579_s28 = sshll.u32 %s1857_s25, 6  ;;  %s1476_s29 = sshll.u32 %s2287_s14, 4  ;;  %s1477_s29 = int_to_ptr.vmem [resolvable:$true] %s1476_s29 }
  0x2b   : > { %1633 = vset.pattern.permute.xlu2 %v1798_v0  ;;  %310 = vperm.xlu1 %1632, %v284_v1   ;;  %v280_v5 = vld [vmem:[%s2363_s5 + $0x8] sm:$0xff]  ;;  %v279_v6 = vld [vmem:[%s2363_s5] sm:$0xff]  ;;  %v288_v8 = vld [vmem:[%s1928_s12 + $0x18] sm:$0xff]  ;;  %s1475_s16 = scalar_lea.hbm %s2364_s6, %s1579_s28  ;;  %s1463_s17 = scalar_lea.sflag [#allocation4], %s1922_s18 }
  0x2c   : > { %296 = vperm.xlu0 %1631, %v282_v2   ;;  %v1564_v9 = vld [vmem:[%s1928_s12 + $0x30] sm:$0xff]  ;;  %v1565_v10 = vld [vmem:[%s1928_s12 + $0x38] sm:$0xff]  ;;  %v285_v24 = vld [vmem:[%s1928_s12] sm:$0xff]  ;;  %s1478_s25 = sshll.u32 %s1475_s16, 4  ;;  %s1748_s8 = scalar_lea.hbm %s2364_s6, 128  ;;  %s1479_s25 = int_to_ptr.hbm [resolvable:$true] %s1478_s25 }
  0x2d   : > { %v286_v25 = vld [vmem:[%s1928_s12 + $0x8] sm:$0xff]  ;;  %v1562_v31 = vld [vmem:[%s1928_s12 + $0x20] sm:$0xff]  ;;  %s1742_s19 = sshra.s32 %s1479_s25, 4  ;;  %s1743_s19 = int_to_ptr.hbm [resolvable:$true] %s1742_s19 }
  0x2e   : > { %v1563_v29 = vld [vmem:[%s1928_s12 + $0x28] sm:$0xff]  ;;  %v275_v42 = vld [vmem:[%s2361_s3] sm:$0xff]  ;;  %s1744_s12 = scalar_lea.hbm %s1743_s19, 64  ;;  %p1749_p0 = scmp.lt.s32.totalorder %s1743_s19, %s2364_s6 }
  0x2f   : > { %v399_v48 = vsel %vm397_vm0, %v275_v42, 0  ;;  %v276_v63 = vld [vmem:[%s2361_s3 + $0x8] sm:$0xff]  ;;  %p1745_p6 = scmp.ne.s32.totalorder %s1743_s19, %s1744_s12  ;;  %p1750_p1 = scmp.lt.s32.totalorder %s1748_s8, %s1744_s12 }
  0x30   : > { %v1989_v55 = vand.u32 4294901760, %v399_v48 }
  0x31   : > { %p1746_p9 = pnand %p1745_p6, %p1886_p11  ;;  %p1751_p3 = por %p1750_p1, %p1749_p0 }
  0x32   : > { %v1996_v60 = vsub.f32 %v399_v48, %v1989_v55 }
  0x33   : > { %305 = vperm.xlu1 %1632, %v283_v3   ;;  %p1747_p13 = pneg %p1746_p9 }
  0x34   : > { %291 = vperm.xlu0 %1631, %v281_v4  }
  0x35   : > { %p1752_p4 = pnand %p1751_p3, %p1747_p13 }
  0x3b   : > { %805 = vperm.xlu1 %1632, %v280_v5  }
  0x3c   : > { %800 = vperm.xlu0 %1631, %v279_v6   ;;  %v2008_v6 = vand.u32 4294901760, %v1996_v60 }
  0x9d   : > { %v311_v11 = vpop.permute.xlu1 %310 }
  0x9e   : > { %v297_v12 = vpop.permute.xlu0 %296 }
  0x9f   : > { %v301_v13 = vmul.f32 %v297_v12, %v287_v7  ;;  %v302_v14 = vmul.f32 %v297_v12, %v288_v8  ;;  %v903_v15 = vmul.f32 %v1564_v9, %v297_v12  ;;  %v904_v16 = vmul.f32 %v1565_v10, %v297_v12 }
  0xa0   : > { %v402_v7 = vsel %vm397_vm0, %v276_v63, 0 }
  0xa1   : > { %v1956_v17 = vadd.f32 %v311_v11, %v301_v13  ;;  %v1958_v18 = vadd.f32 %v311_v11, %v302_v14  ;;  %v1960_v19 = vadd.f32 %v903_v15, %v311_v11  ;;  %v1962_v20 = vadd.f32 %v904_v16, %v311_v11 }
  0xa3   : > { %v319_v21 = vsub.f32 0.0, %v1956_v17  ;;  %v320_v22 = vsub.f32 0.0, %v1958_v18  ;;  %v912_v23 = vsub.f32 0.0, %v1962_v20  ;;  %v911_v28 = vsub.f32 0.0, %v1960_v19 }
  0xa5   : > { %v325_v26 = vmul.f32 1.442695, %v319_v21  ;;  %v327_v27 = vmul.f32 1.442695, %v320_v22  ;;  %v919_v30 = vmul.f32 1.442695, %v912_v23  ;;  %v306_v35 = vpop.permute.xlu1 %305 }
  0xa6   : > { %v292_v32 = vpop.permute.xlu0 %291  ;;  %v917_v37 = vmul.f32 1.442695, %v911_v28  ;;  %v2022_v22 = vand.u32 4294901760, %v402_v7 }
  0xa7   : > { %1634 = vpow2.f32 %v325_v26  ;;  %v299_v33 = vmul.f32 %v292_v32, %v285_v24  ;;  %v300_v34 = vmul.f32 %v292_v32, %v286_v25  ;;  %v902_v36 = vmul.f32 %v1563_v29, %v292_v32 }
  0xa8   : > { %1636 = vpow2.f32 %v327_v27  ;;  %v901_v40 = vmul.f32 %v1562_v31, %v292_v32  ;;  %v425_v25 = vsub.f32 %v1996_v60, %v2008_v6 }
  0xa9   : > { %v1972_v38 = vadd.f32 %v306_v35, %v299_v33  ;;  %v1974_v39 = vadd.f32 %v306_v35, %v300_v34  ;;  %1638 = vpow2.f32 %v919_v30  ;;  %v1976_v41 = vadd.f32 %v902_v36, %v306_v35 }
  0xaa   : > { %1640 = vpow2.f32 %v917_v37  ;;  %v1983_v47 = vadd.f32 %v901_v40, %v306_v35  ;;  %v2043_v36 = vsub.f32 %v402_v7, %v2022_v22 }
  0xab   : > { %v317_v43 = vsub.f32 0.0, %v1972_v38  ;;  %v318_v44 = vsub.f32 0.0, %v1974_v39  ;;  %v910_v51 = vsub.f32 0.0, %v1976_v41 }
  0xac   : > { %v909_v57 = vsub.f32 0.0, %v1983_v47 }
  0xad   : > { %v1635_v45 = vpop.eup %1634  ;;  %v321_v46 = vmul.f32 1.442695, %v317_v43  ;;  %v323_v54 = vmul.f32 1.442695, %v318_v44  ;;  %v915_v58 = vmul.f32 1.442695, %v910_v51 }
  0xae   : > { %v1637_v49 = vpop.eup %1636  ;;  %v331_v50 = vadd.f32 1.0, %v1635_v45  ;;  %v913_v62 = vmul.f32 1.442695, %v909_v57  ;;  %v2048_v43 = vand.u32 4294901760, %v425_v25 }
  0xaf   : > { %v1987_v52 = vadd.f32 1.0, %v1637_v49  ;;  %1642 = vpow2.f32 %v321_v46  ;;  %v1639_v53 = vpop.eup %1638 }
  0xb0   : > { %1644 = vrcp.f32 %v331_v50  ;;  %v1992_v56 = vadd.f32 1.0, %v1639_v53  ;;  %v1641_v59 = vpop.eup %1640  ;;  %v372_v3 = vand.u32 2147483647, %v331_v50  ;;  %vm368_vm1 = vweird.f32 %v331_v50 }
  0xb1   : > { %1646 = vrcp.f32 %v1987_v52  ;;  %v2002_v1 = vadd.f32 1.0, %v1641_v59  ;;  %v374_v12 = vand.u32 2147483648, %v331_v50  ;;  %v387_v13 = vand.u32 2147483647, %v1987_v52 }
  0xb2   : > { %1648 = vpow2.f32 %v323_v54  ;;  %vm2013_vm2 = vcmp.eq.f32.partialorder %v372_v3, 8.507059e+37  ;;  %v389_v26 = vand.u32 2147483648, %v1987_v52  ;;  %vm383_vm4 = vweird.f32 %v1987_v52 }
  0xb3   : > { %1650 = vrcp.f32 %v1992_v56  ;;  %v375_v32 = vor.u32 1.1754944e-38, %v374_v12  ;;  %vm2034_vm5 = vcmp.eq.f32.partialorder %v387_v13, 8.507059e+37  ;;  %v2064_v59 = vand.u32 4294901760, %v2043_v36 }
  0xb4   : > { %1652 = vpow2.f32 %v915_v58  ;;  %v390_v44 = vor.u32 1.1754944e-38, %v389_v26  ;;  %vm960_vm11 = vweird.f32 %v2002_v1 }
  0xb5   : > { %v1643_v61 = vpop.eup %1642  ;;  %v433_v46 = vsub.f32 %v2043_v36, %v2064_v59 }
  0xb6   : > { %v1645_v0 = vpop.eup %1644  ;;  %v2004_v2 = vadd.f32 1.0, %v1643_v61 }
  0xb7   : > { %v1647_v4 = vpop.eup %1646  ;;  %v364_v5 = vmul.f32 %v1645_v0, %v331_v50  ;;  %vm369_vm3 = vweird.f32 %v1645_v0 }
  0xb8   : > { %1654 = vrcp.f32 %v2004_v2  ;;  %v379_v9 = vmul.f32 %v1647_v4, %v1987_v52  ;;  %v1649_v10 = vpop.eup %1648  ;;  %v342_v24 = vand.u32 2147483647, %v2004_v2  ;;  %vm370_vm6 = vmor %vm368_vm1, %vm369_vm3  ;;  %v344_v35 = vand.u32 2147483648, %v2004_v2 }
  0xb9   : > { %1656 = vpow2.f32 %v913_v62  ;;  %v365_v8 = vsub.f32 1.0, %v364_v5  ;;  %v2018_v14 = vpop.eup %1650  ;;  %v2020_v15 = vadd.f32 1.0, %v1649_v10  ;;  %vm384_vm7 = vweird.f32 %v1647_v4 }
  0xba   : > { %1658 = vrcp.f32 %v2002_v1  ;;  %v380_v21 = vsub.f32 1.0, %v379_v9  ;;  %v1653_v23 = vpop.eup %1652  ;;  %v971_v31 = vmul.f32 %v2018_v14, %v1992_v56  ;;  %vm338_vm8 = vweird.f32 %v2004_v2  ;;  %vm385_vm10 = vmor %vm383_vm4, %vm384_vm7 }
  0xbb   : > { %v366_v16 = vmul.f32 %v1645_v0, %v365_v8  ;;  %1660 = vrcp.f32 %v2020_v15  ;;  %v2029_v27 = vadd.f32 1.0, %v1653_v23  ;;  %vm2053_vm9 = vcmp.eq.f32.partialorder %v342_v24, 8.507059e+37 }
  0xbc   : > { %v381_v29 = vmul.f32 %v1647_v4, %v380_v21  ;;  %v972_v49 = vsub.f32 1.0, %v971_v31  ;;  %v345_v57 = vor.u32 1.1754944e-38, %v344_v35  ;;  %vm353_vm13 = vweird.f32 %v2020_v15 }
  0xbd   : > { %v367_v28 = vadd.f32 %v1645_v0, %v366_v16  ;;  %1662 = vrcp.f32 %v2029_v27  ;;  %v357_v10 = vand.u32 2147483647, %v2020_v15  ;;  %vm975_vm1 = vweird.f32 %v1992_v56 }
  0xbe   : > { %v1655_v30 = vpop.eup %1654  ;;  %v382_v48 = vadd.f32 %v1647_v4, %v381_v29  ;;  %v2079_v5 = vmul.f32 %v2018_v14, %v972_v49 }
  0xbf   : > { %v1657_v34 = vpop.eup %1656  ;;  %v371_v40 = vsel %vm370_vm6, %v1645_v0, %v367_v28  ;;  %v334_v42 = vmul.f32 %v1655_v30, %v2004_v2  ;;  %vm339_vm12 = vweird.f32 %v1655_v30  ;;  %vm358_vm3 = vcmp.eq.f32.partialorder %v357_v10, 8.507059e+37 }
  0xc0   : > { %v2045_v37 = vpop.eup %1658  ;;  %v376_v45 = vsel %vm2013_vm2, %v375_v32, %v371_v40  ;;  %v2057_v50 = vadd.f32 1.0, %v1657_v34  ;;  %v386_v58 = vsel %vm385_vm10, %v1647_v4, %v382_v48  ;;  %v359_v4 = vand.u32 2147483648, %v2020_v15  ;;  %vm340_vm14 = vmor %vm338_vm8, %vm339_vm12 }
  0xc1   : > { %v395_v51 = vmul.f32 %v376_v45, %v1956_v17  ;;  %v335_v53 = vsub.f32 1.0, %v334_v42  ;;  %v1661_v54 = vpop.eup %1660  ;;  %v956_v61 = vmul.f32 %v2045_v37, %v2002_v1  ;;  %v391_v17 = vsel %vm2034_vm5, %v390_v44, %v386_v58 }
  0xc2   : > { %v396_v52 = vmul.f32 %v391_v17, %v1958_v18  ;;  %v349_v3 = vmul.f32 %v1661_v54, %v2020_v15  ;;  %1664 = vrcp.f32 %v2057_v50  ;;  %vm354_vm15 = vweird.f32 %v1661_v54 }
  0xc3   : > { %v2068_v62 = vand.u32 4294901760, %v395_v51  ;;  %v336_v63 = vmul.f32 %v1655_v30, %v335_v53  ;;  %v2073_v0 = vpop.eup %1662  ;;  %v957_v13 = vsub.f32 1.0, %v956_v61  ;;  %v360_v24 = vor.u32 1.1754944e-38, %v359_v4  ;;  %vm355_vm2 = vmor %vm353_vm13, %vm354_vm15 }
  0xc4   : > { %v2086_v9 = vand.u32 4294901760, %v396_v52  ;;  %v350_v18 = vsub.f32 1.0, %v349_v3  ;;  %v941_v11 = vmul.f32 %v2073_v0, %v2029_v27  ;;  %vm961_vm0 = vweird.f32 %v2045_v37 }
  0xc5   : > { %419 = vmatpush.msra.mxu0 %v2068_v62  ;;  %520 = vmatpush.msra.mxu3 %v2068_v62  ;;  %v454_v7 = vsub.f32 %v395_v51, %v2068_v62  ;;  %v337_v8 = vadd.f32 %v1655_v30, %v336_v63  ;;  %v958_v28 = vmul.f32 %v2045_v37, %v957_v13  ;;  %v966_v40 = vand.u32 2147483648, %v2002_v1  ;;  %vm2121_vm4 = vmor %vm960_vm11, %vm961_vm0 }
  0xc6   : > { %v2095_v21 = vsub.f32 %v396_v52, %v2086_v9  ;;  %v351_v23 = vmul.f32 %v1661_v54, %v350_v18  ;;  %v942_v33 = vsub.f32 1.0, %v941_v11  ;;  %vm976_vm6 = vweird.f32 %v2018_v14 }
  0xc7   : > { %490 = vmatpush.msra.mxu2 %v454_v7  ;;  %v455_v12 = vand.u32 4294901760, %v454_v7  ;;  %v341_v16 = vsel %vm340_vm14, %v1655_v30, %v337_v8  ;;  %v964_v30 = vand.u32 2147483647, %v2002_v1  ;;  %v959_v35 = vadd.f32 %v2045_v37, %v958_v28 }
  0xc8   : > { %v346_v25 = vsel %vm2053_vm9, %v345_v57, %v341_v16  ;;  %v645_v29 = vand.u32 4294901760, %v2095_v21  ;;  %v352_v31 = vadd.f32 %v1661_v54, %v351_v23  ;;  %v2104_v32 = vpop.eup %1664  ;;  %v967_v49 = vor.u32 1.1754944e-38, %v966_v40  ;;  %vm2163_vm9 = vmor %vm975_vm1, %vm976_vm6 }
  0xc9   : > { %v456_v26 = vsub.f32 %v454_v7, %v455_v12  ;;  %v393_v2 = vmul.f32 %v346_v25, %v1972_v38  ;;  %v963_v48 = vsel %vm2121_vm4, %v2045_v37, %v959_v35  ;;  %vm965_vm5 = vcmp.eq.f32.partialorder %v964_v30, 8.507059e+37 }
  0xca   : > { %v646_v42 = vsub.f32 %v2095_v21, %v645_v29  ;;  %v356_v44 = vsel %vm355_vm2, %v1661_v54, %v352_v31  ;;  %v979_v54 = vand.u32 2147483647, %v1992_v56  ;;  %v943_v57 = vmul.f32 %v2073_v0, %v942_v33 }
  0xcb   : > { %v457_v34 = vand.u32 4294901760, %v456_v26  ;;  %v2112_v38 = vand.u32 4294901760, %v393_v2  ;;  %v361_v15 = vsel %vm358_vm3, %v360_v24, %v356_v44  ;;  %v968_v37 = vsel %vm965_vm5, %v967_v49, %v963_v48 }
  0xcc   : > { %v647_v51 = vand.u32 4294901760, %v646_v42  ;;  %v394_v53 = vmul.f32 %v361_v15, %v1974_v39  ;;  %v926_v58 = vmul.f32 %v2104_v32, %v2057_v50  ;;  %v981_v61 = vand.u32 2147483648, %v1992_v56 }
  0xcd   : > { %458 = vmatpush.msra.mxu1 %v457_v34  ;;  %421 = vmatpush.msra.mxu0 %v2112_v38  ;;  %v460_v1 = vsub.f32 %v393_v2, %v2112_v38  ;;  %v974_v17 = vadd.f32 %v2018_v14, %v2079_v5  ;;  %vm946_vm7 = vweird.f32 %v2073_v0  ;;  %v2147_v52 = vand.u32 4294901760, %v433_v46 }
  0xce   : > { %522 = vmatpush.msra.mxu3 %v2112_v38  ;;  %427 = vmatmul.f32.vlgmr.msra.gmra.mxu0 %v2048_v43  ;;  %v2142_v63 = vand.u32 4294901760, %v394_v53  ;;  %v927_v3 = vsub.f32 1.0, %v926_v58  ;;  %v987_v8 = vmul.f32 %v968_v37, %v1960_v19  ;;  %v936_v18 = vand.u32 2147483648, %v2057_v50  ;;  %v278_v37 = vld [vmem:[%s2362_s4 + $0x8] sm:$0xff] }
  0xcf   : > { %526 = vmatmul.f32.vlgmr.msra.gmra.mxu3 %v2008_v6  ;;  %553 = vmatpush.msrb.mxu0 %v455_v12  ;;  %v461_v39 = vand.u32 4294901760, %v460_v1  ;;  %v944_v10 = vadd.f32 %v2073_v0, %v943_v57  ;;  %vm931_vm8 = vweird.f32 %v2104_v32  ;;  %v934_v11 = vand.u32 2147483647, %v2057_v50 }
  0xd0   : > { %648 = vmatpush.msrb.mxu3 %v647_v51  ;;  %493 = vmatpush.msra.mxu2 %v460_v1  ;;  %v650_v4 = vsub.f32 %v394_v53, %v2142_v63  ;;  %v928_v5 = vmul.f32 %v2104_v32, %v927_v3  ;;  %vm945_vm10 = vweird.f32 %v2029_v27  ;;  %v951_v12 = vand.u32 2147483648, %v2029_v27  ;;  %v277_v51 = vld [vmem:[%s2362_s4] sm:$0xff] }
  0xd1   : > { %496 = vmatmul.f32.vlgmr.msra.gmra.mxu2 %v1996_v60  ;;  %557 = vmatpush.msrb.mxu0 %v461_v39  ;;  %v462_v7 = vsub.f32 %v460_v1, %v461_v39  ;;  %v978_v23 = vsel %vm2163_vm9, %v2018_v14, %v974_v17  ;;  %vm2174_vm11 = vmor %vm945_vm10, %vm946_vm7  ;;  %v949_v56 = vand.u32 2147483647, %v2029_v27  ;;  %vm930_vm12 = vweird.f32 %v2057_v50 }
  0xd2   : > { %609 = vmatpush.msrb.mxu2 %v2086_v9  ;;  %v651_v16 = vand.u32 4294901760, %v650_v4  ;;  %v929_v25 = vadd.f32 %v2104_v32, %v928_v5  ;;  %v982_v26 = vor.u32 1.1754944e-38, %v981_v61  ;;  %v2184_v28 = vand.u32 4294901760, %v987_v8  ;;  %vm932_vm13 = vmor %vm930_vm12, %vm931_vm8  ;;  %786 = vperm.xlu2 %1633, %v277_v51  }
  0xd3   : > { %680 = vmatpush.msra.mxu0 %v2095_v21  ;;  %v463_v13 = vand.u32 4294901760, %v462_v7  ;;  %v937_v2 = vor.u32 1.1754944e-38, %v936_v18  ;;  %vm980_vm14 = vcmp.eq.f32.partialorder %v979_v54, 8.507059e+37  ;;  %v948_v27 = vsel %vm2174_vm11, %v2073_v0, %v944_v10 }
  0xd4   : > { %611 = vmatpush.msrb.mxu2 %v2142_v63  ;;  %v652_v14 = vsub.f32 %v650_v4, %v651_v16  ;;  %v933_v50 = vsel %vm932_vm13, %v2104_v32, %v929_v25  ;;  %vm935_vm15 = vcmp.eq.f32.partialorder %v934_v11, 8.507059e+37  ;;  %v983_v21 = vsel %vm980_vm14, %v982_v26, %v978_v23 }
  0xd5   : > { %683 = vmatpush.msra.mxu0 %v650_v4  ;;  %464 = vmatpush.msra.mxu1 %v463_v13  ;;  %v938_v30 = vsel %vm935_vm15, %v937_v2, %v933_v50  ;;  %vm950_vm0 = vcmp.eq.f32.partialorder %v949_v56, 8.507059e+37  ;;  %v1039_v34 = vsub.f32 %v987_v8, %v2184_v28  ;;  %v988_v32 = vmul.f32 %v983_v21, %v1962_v20  ;;  %v2268_v21 = vpop.permute.xlu1 %805 }
  0xd6   : > { %743 = vmatpush.msra.mxu2 %v645_v29  ;;  %435 = vmatmul.f32.gmra.mxu0 %v2147_v52  ;;  %v952_v29 = vor.u32 1.1754944e-38, %v951_v12  ;;  %v653_v31 = vand.u32 4294901760, %v652_v14  ;;  %v985_v33 = vmul.f32 %v938_v30, %v1983_v47  ;;  %v2259_v12 = vpop.permute.xlu0 %800 }
  0xd7   : > { %466 = vmatmul.f32.vlgmr.msra.gmra.mxu1 %v1989_v55  ;;  %532 = vmatmul.f32.gmra.mxu3 %v2064_v59  ;;  %v1193_v42 = vand.u32 4294901760, %v988_v32 }
  0xd8   : > { %747 = vmatpush.msra.mxu2 %v651_v16  ;;  %582 = vmatpush.msrb.mxu1 %v2068_v62  ;;  %v953_v0 = vsel %vm950_vm0, %v952_v29, %v948_v27  ;;  %v1005_v35 = vand.u32 4294901760, %v985_v33  ;;  %v1040_v62 = vand.u32 4294901760, %v1039_v34 }
  0xd9   : > { %654 = vmatpush.msrb.mxu3 %v653_v31  ;;  %501 = vmatmul.f32.gmra.mxu2 %v2043_v36  ;;  %v986_v40 = vmul.f32 %v953_v0, %v1976_v41 }
  0xda   : > { %584 = vmatpush.msrb.mxu1 %v2112_v38  ;;  %v1045_v47 = vsub.f32 %v985_v33, %v1005_v35  ;;  %v1041_v41 = vsub.f32 %v1039_v34, %v1040_v62  ;;  %791 = vperm.xlu2 %1633, %v278_v37  }
  0xdb   : > { %772 = vmatpush.msra.mxu3 %v2086_v9  ;;  %v1195_v38 = vand.u32 4294901760, %v986_v40 }
  0xdc   : > { %710 = vmatpush.msra.mxu1 %v2086_v9  ;;  %v1046_v20 = vand.u32 4294901760, %v1045_v47  ;;  %v1229_v9 = vsub.f32 %v988_v32, %v1193_v42  ;;  %v1042_v15 = vand.u32 4294901760, %v1041_v41 }
  0xdd   : > { %774 = vmatpush.msra.mxu3 %v2142_v63  ;;  %v1235_v45 = vsub.f32 %v986_v40, %v1195_v38 }
  0xde   : > { %712 = vmatpush.msra.mxu1 %v2142_v63  ;;  %559 = vmatmul.f32.vlgmr.msrb.gmra.mxu0 %v1989_v55  ;;  %v1047_v44 = vsub.f32 %v1045_v47, %v1046_v20  ;;  %v1230_v46 = vand.u32 4294901760, %v1229_v9 }
  0xdf   : > { %470 = vmatmul.f32.gmra.mxu1 %v2022_v22  ;;  %656 = vmatmul.f32.vlgmr.msrb.gmra.mxu3 %v1989_v55  ;;  %v1236_v49 = vand.u32 4294901760, %v1235_v45 }
  0xe0   : > { %1004 = vmatpush.msrb.mxu0 %v2184_v28  ;;  %1105 = vmatpush.msrb.mxu3 %v2184_v28  ;;  %v1048_v48 = vand.u32 4294901760, %v1047_v44  ;;  %v1231_v1 = vsub.f32 %v1229_v9, %v1230_v46 }
  0xe1   : > { %617 = vmatmul.f32.vlgmr.msrb.gmra.mxu2 %v2048_v43  ;;  %v1237_v53 = vsub.f32 %v1235_v45, %v1236_v49 }
  0xe2   : > { %1006 = vmatpush.msrb.mxu0 %v1005_v35  ;;  %1075 = vmatpush.msrb.mxu2 %v1039_v34  ;;  %v1232_v54 = vand.u32 4294901760, %v1231_v1 }
  0xe3   : > { %1107 = vmatpush.msrb.mxu3 %v1005_v35  ;;  %v1238_v57 = vand.u32 4294901760, %v1237_v53 }
  0xe4   : > { %1078 = vmatpush.msrb.mxu2 %v1045_v47 }
  0xe6   : > { %563 = vmatmul.f32.gmra.mxu0 %v2022_v22 }
  0xe7   : > { %586 = vmatmul.f32.vlgmr.msrb.gmra.mxu1 %v1989_v55  ;;  %660 = vmatmul.f32.gmra.mxu3 %v2022_v22 }
  0xe8   : > { %1043 = vmatpush.msrb.mxu1 %v1042_v15 }
  0xe9   : > { %625 = vmatmul.f32.gmra.mxu2 %v2147_v52 }
  0xea   : > { %1049 = vmatpush.msrb.mxu1 %v1048_v48 }
  0xee   : > { %686 = vmatmul.f32.vlgmr.msra.gmra.mxu0 %v1996_v60 }
  0xef   : > { %590 = vmatmul.f32.gmra.mxu1 %v2022_v22  ;;  %776 = vmatmul.f32.vlgmr.msra.gmra.mxu3 %v1989_v55 }
  0xf0   : > { %1138 = vmatpush.msra.mxu0 %v1040_v62  ;;  %1233 = vmatpush.msra.mxu3 %v1232_v54 }
  0xf1   : > { %749 = vmatmul.f32.vlgmr.msra.gmra.mxu2 %v1989_v55 }
  0xf2   : > { %1142 = vmatpush.msra.mxu0 %v1046_v20  ;;  %1194 = vmatpush.msra.mxu2 %v1193_v42 }
  0xf3   : > { %1239 = vmatpush.msra.mxu3 %v1238_v57 }
  0xf4   : > { %1196 = vmatpush.msra.mxu2 %v1195_v38 }
  0xf6   : > { %691 = vmatmul.f32.gmra.mxu0 %v2043_v36 }
  0xf7   : > { %716 = vmatmul.f32.vlgmr.msra.gmra.mxu1 %v2008_v6  ;;  %780 = vmatmul.f32.gmra.mxu3 %v2022_v22 }
  0xf8   : > { %1167 = vmatpush.msra.mxu1 %v2184_v28 }
  0xf9   : > { %753 = vmatmul.f32.gmra.mxu2 %v2022_v22 }
  0xfa   : > { %1169 = vmatpush.msra.mxu1 %v1005_v35 }
  0xfe   : > { %1012 = vmatmul.f32.vlgmr.msrb.gmra.mxu0 %v2048_v43 }
  0xff   : > { %722 = vmatmul.f32.gmra.mxu1 %v2064_v59  ;;  %1111 = vmatmul.f32.vlgmr.msrb.gmra.mxu3 %v2008_v6 }
 0x100   : > { %1265 = vmatpush.msrb.mxu0 %v1229_v9  ;;  %1357 = vmatpush.msrb.mxu3 %v1193_v42 }
 0x101   : > { %1081 = vmatmul.f32.vlgmr.msrb.gmra.mxu2 %v1996_v60 }
 0x102   : > { %1268 = vmatpush.msrb.mxu0 %v1235_v45  ;;  %1328 = vmatpush.msrb.mxu2 %v1230_v46 }
 0x103   : > { %1359 = vmatpush.msrb.mxu3 %v1195_v38 }
 0x104   : > { %1332 = vmatpush.msrb.mxu2 %v1236_v49 }
 0x106   : > { %1020 = vmatmul.f32.gmra.mxu0 %v2147_v52 }
 0x107   : > { %1051 = vmatmul.f32.vlgmr.msrb.gmra.mxu1 %v1989_v55  ;;  %1117 = vmatmul.f32.gmra.mxu3 %v2064_v59 }
 0x108   : > { %1295 = vmatpush.msrb.mxu1 %v1193_v42 }
 0x109   : > { %1086 = vmatmul.f32.gmra.mxu2 %v2043_v36 }
 0x10a   : > { %1297 = vmatpush.msrb.mxu1 %v1195_v38 }
 0x10e   : > { %1144 = vmatmul.f32.vlgmr.msra.gmra.mxu0 %v1989_v55 }
 0x10f   : > { %1055 = vmatmul.f32.gmra.mxu1 %v2022_v22  ;;  %1241 = vmatmul.f32.vlgmr.msra.gmra.mxu3 %v1989_v55 }
 0x111   : > { %1202 = vmatmul.f32.vlgmr.msra.gmra.mxu2 %v2048_v43 }
 0x116   : > { %1148 = vmatmul.f32.gmra.mxu0 %v2022_v22 }
 0x117   : > { %1171 = vmatmul.f32.vlgmr.msra.gmra.mxu1 %v1989_v55  ;;  %1245 = vmatmul.f32.gmra.mxu3 %v2022_v22 }
 0x119   : > { %1210 = vmatmul.f32.gmra.mxu2 %v2147_v52 }
 0x11e   : > { %1271 = vmatmul.f32.vlgmr.msrb.gmra.mxu0 %v1996_v60 }
 0x11f   : > { %1175 = vmatmul.f32.gmra.mxu1 %v2022_v22  ;;  %1361 = vmatmul.f32.vlgmr.msrb.gmra.mxu3 %v1989_v55 }
 0x121   : > { %1334 = vmatmul.f32.vlgmr.msrb.gmra.mxu2 %v1989_v55 }
 0x126   : > { %1276 = vmatmul.f32.gmra.mxu0 %v2043_v36 }
 0x127   : > { %1301 = vmatmul.f32.vlgmr.msrb.gmra.mxu1 %v2008_v6  ;;  %1365 = vmatmul.f32.gmra.mxu3 %v2022_v22 }
 0x129   : > { %1338 = vmatmul.f32.gmra.mxu2 %v2022_v22 }
 0x12c   : > { %v2256_v6 = vpop.permute.xlu2 %786 }
 0x12f   : > { %1307 = vmatmul.f32.gmra.mxu1 %v2064_v59 }
 0x134   : > { %v2265_v56 = vpop.permute.xlu2 %791 }
 0x14b   : > { %v428_v43 = vpop.f32.mrf.mxu0 }
 0x152   : > { %v527_v58 = vpop.f32.mrf.mxu3 }
 0x153   : > { %v436_v61 = vpop.f32.mrf.mxu0 }
 0x154   : > { %v467_v39 = vpop.f32.mrf.mxu1  ;;  %v497_v63 = vpop.f32.mrf.mxu2 }
 0x155   : > { %v468_v60 = vadd.f32 %v467_v39, %v428_v43 }
 0x157   : > { %v498_v55 = vadd.f32 %v497_v63, %v468_v60 }
 0x159   : > { %v528_v36 = vadd.f32 %v527_v58, %v498_v55 }
 0x15a   : > { %v533_v17 = vpop.f32.mrf.mxu3 }
 0x15b   : > { %v560_v3 = vpop.f32.mrf.mxu0 }
 0x15c   : > { %v471_v52 = vpop.f32.mrf.mxu1  ;;  %v502_v4 = vpop.f32.mrf.mxu2  ;;  %v561_v8 = vadd.f32 %v560_v3, %v528_v36 }
 0x15d   : > { %v472_v7 = vadd.f32 %v471_v52, %v436_v61 }
 0x15f   : > { %v503_v59 = vadd.f32 %v502_v4, %v472_v7 }
 0x161   : > { %v534_v13 = vadd.f32 %v533_v17, %v503_v59 }
 0x162   : > { %v657_v18 = vpop.f32.mrf.mxu3 }
 0x163   : > { %v564_v22 = vpop.f32.mrf.mxu0 }
 0x164   : > { %v587_v10 = vpop.f32.mrf.mxu1  ;;  %v618_v11 = vpop.f32.mrf.mxu2  ;;  %v565_v23 = vadd.f32 %v564_v22, %v534_v13 }
 0x165   : > { %v588_v5 = vadd.f32 %v587_v10, %v561_v8  ;;  %v658_v29 = vadd.f32 %v657_v18, %v618_v11 }
 0x167   : > { %v794_v19 = vmul.f32 %v2256_v6, %v588_v5 }
 0x169   : > { %v2262_v16 = vadd.f32 %v2259_v12, %v794_v19 }
 0x16a   : > { %v661_v25 = vpop.f32.mrf.mxu3 }
 0x16b   : > { %v812_v24 = vsub.f32 0.0, %v2262_v16  ;;  %v687_v14 = vpop.f32.mrf.mxu0 }
 0x16c   : > { %v591_v26 = vpop.f32.mrf.mxu1  ;;  %v626_v27 = vpop.f32.mrf.mxu2  ;;  %v688_v30 = vadd.f32 %v687_v14, %v658_v29 }
 0x16d   : > { %v816_v28 = vmul.f32 1.442695, %v812_v24  ;;  %v592_v2 = vadd.f32 %v591_v26, %v565_v23  ;;  %v662_v38 = vadd.f32 %v661_v25, %v626_v27 }
 0x16f   : > { %1666 = vpow2.f32 %v816_v28  ;;  %v796_v50 = vmul.f32 %v2265_v56, %v592_v2 }
 0x171   : > { %v2271_v31 = vadd.f32 %v2268_v21, %v796_v50 }
 0x172   : > { %v777_v0 = vpop.f32.mrf.mxu3 }
 0x173   : > { %v814_v33 = vsub.f32 0.0, %v2271_v31  ;;  %v692_v34 = vpop.f32.mrf.mxu0 }
 0x174   : > { %v717_v32 = vpop.f32.mrf.mxu1  ;;  %v750_v62 = vpop.f32.mrf.mxu2  ;;  %v693_v9 = vadd.f32 %v692_v34, %v662_v38 }
 0x175   : > { %v1667_v35 = vpop.eup %1666  ;;  %v820_v40 = vmul.f32 1.442695, %v814_v33  ;;  %v718_v47 = vadd.f32 %v717_v32, %v688_v30 }
 0x176   : > { %v824_v42 = vadd.f32 1.0, %v1667_v35 }
 0x177   : > { %1668 = vpow2.f32 %v820_v40  ;;  %v751_v20 = vadd.f32 %v750_v62, %v718_v47 }
 0x178   : > { %1670 = vrcp.f32 %v824_v42  ;;  %v837_v63 = vand.u32 2147483647, %v824_v42  ;;  %v839_v60 = vand.u32 2147483648, %v824_v42  ;;  %vm833_vm2 = vweird.f32 %v824_v42 }
 0x179   : > { %v778_v41 = vadd.f32 %v777_v0, %v751_v20 }
 0x17a   : > { %v781_v45 = vpop.f32.mrf.mxu3  ;;  %v840_v22 = vor.u32 1.1754944e-38, %v839_v60  ;;  %vm838_vm4 = vcmp.eq.f32.partialorder %v837_v63, 8.507059e+37 }
 0x17b   : > { %v795_v44 = vmul.f32 %v2256_v6, %v778_v41  ;;  %v1013_v46 = vpop.f32.mrf.mxu0 }
 0x17c   : > { %v723_v15 = vpop.f32.mrf.mxu1  ;;  %v754_v1 = vpop.f32.mrf.mxu2 }
 0x17d   : > { %v1669_v48 = vpop.eup %1668  ;;  %v2276_v49 = vadd.f32 %v2259_v12, %v795_v44  ;;  %v724_v51 = vadd.f32 %v723_v15, %v693_v9 }
 0x17e   : > { %v1671_v53 = vpop.eup %1670  ;;  %v826_v54 = vadd.f32 1.0, %v1669_v48 }
 0x17f   : > { %v829_v57 = vmul.f32 %v1671_v53, %v824_v42  ;;  %v813_v37 = vsub.f32 0.0, %v2276_v49  ;;  %v755_v43 = vadd.f32 %v754_v1, %v724_v51  ;;  %vm834_vm1 = vweird.f32 %v1671_v53 }
 0x180   : > { %1672 = vrcp.f32 %v826_v54  ;;  %vm835_vm3 = vmor %vm833_vm2, %vm834_vm1  ;;  %v869_v26 = vand.u32 2147483648, %v826_v54  ;;  %v867_v2 = vand.u32 2147483647, %v826_v54  ;;  %vm863_vm6 = vweird.f32 %v826_v54 }
 0x181   : > { %v830_v58 = vsub.f32 1.0, %v829_v57  ;;  %v818_v61 = vmul.f32 1.442695, %v813_v37  ;;  %v782_v39 = vadd.f32 %v781_v45, %v755_v43 }
 0x182   : > { %v1112_v3 = vpop.f32.mrf.mxu3  ;;  %v870_v0 = vor.u32 1.1754944e-38, %v869_v26  ;;  %vm868_vm8 = vcmp.eq.f32.partialorder %v867_v2, 8.507059e+37 }
 0x183   : > { %v831_v17 = vmul.f32 %v1671_v53, %v830_v58  ;;  %1674 = vpow2.f32 %v818_v61  ;;  %v797_v52 = vmul.f32 %v2265_v56, %v782_v39  ;;  %v1021_v55 = vpop.f32.mrf.mxu0 }
 0x184   : > { %v1052_v4 = vpop.f32.mrf.mxu1  ;;  %v1082_v8 = vpop.f32.mrf.mxu2 }
 0x185   : > { %v832_v36 = vadd.f32 %v1671_v53, %v831_v17  ;;  %v2281_v7 = vadd.f32 %v2268_v21, %v797_v52  ;;  %v1053_v25 = vadd.f32 %v1052_v4, %v1013_v46 }
 0x186   : > { %v1673_v18 = vpop.eup %1672 }
 0x187   : > { %v836_v10 = vsel %vm835_vm3, %v1671_v53, %v832_v36  ;;  %v859_v59 = vmul.f32 %v1673_v18, %v826_v54  ;;  %v815_v5 = vsub.f32 0.0, %v2281_v7  ;;  %vm864_vm5 = vweird.f32 %v1673_v18 }
 0x188   : > { %v841_v11 = vsel %vm838_vm4, %v840_v22, %v836_v10  ;;  %v1083_v30 = vadd.f32 %v1082_v8, %v1053_v25  ;;  %vm865_vm7 = vmor %vm863_vm6, %vm864_vm5 }
 0x189   : > { %v1675_v19 = vpop.eup %1674  ;;  %v888_v13 = vmul.f32 %v841_v11, %v2262_v16  ;;  %v860_v23 = vsub.f32 1.0, %v859_v59  ;;  %v822_v24 = vmul.f32 1.442695, %v815_v5 }
 0x18a   : > { %v825_v14 = vadd.f32 1.0, %v1675_v19  ;;  %v1118_v27 = vpop.f32.mrf.mxu3  ;;  %v1113_v47 = vadd.f32 %v1112_v3, %v1083_v30 }
 0x18b   : > { %892 = vst [vmem:[%s2287_s14] sm:$0xff] %v888_v13  ;;  %v861_v28 = vmul.f32 %v1673_v18, %v860_v23  ;;  %1676 = vpow2.f32 %v822_v24  ;;  %v1145_v29 = vpop.f32.mrf.mxu0 }
 0x18c   : > { %1678 = vrcp.f32 %v825_v14  ;;  %v1056_v50 = vpop.f32.mrf.mxu1  ;;  %v1087_v33 = vpop.f32.mrf.mxu2  ;;  %v1146_v41 = vadd.f32 %v1145_v29, %v1113_v47  ;;  %v852_v1 = vand.u32 2147483647, %v825_v14  ;;  %v854_v53 = vand.u32 2147483648, %v825_v14 }
 0x18d   : > { %v862_v16 = vadd.f32 %v1673_v18, %v861_v28  ;;  %v1057_v62 = vadd.f32 %v1056_v50, %v1021_v55  ;;  %vm848_vm10 = vweird.f32 %v825_v14 }
 0x18e   : > { %vm853_vm12 = vcmp.eq.f32.partialorder %v852_v1, 8.507059e+37  ;;  %v855_v61 = vor.u32 1.1754944e-38, %v854_v53 }
 0x18f   : > { %v866_v34 = vsel %vm865_vm7, %v1673_v18, %v862_v16  ;;  %v1088_v46 = vadd.f32 %v1087_v33, %v1057_v62 }
 0x190   : > { %v871_v32 = vsel %vm868_vm8, %v870_v0, %v866_v34 }
 0x191   : > { %v1677_v35 = vpop.eup %1676  ;;  %v890_v40 = vmul.f32 %v871_v32, %v2271_v31  ;;  %v1119_v37 = vadd.f32 %v1118_v27, %v1088_v46 }
 0x192   : > { %v1679_v42 = vpop.eup %1678  ;;  %v827_v20 = vadd.f32 1.0, %v1677_v35  ;;  %v1242_v9 = vpop.f32.mrf.mxu3 }
 0x193   : > { %894 = vst [vmem:[%s2287_s14 + $0x10] sm:$0xff] %v890_v40  ;;  %v844_v38 = vmul.f32 %v1679_v42, %v825_v14  ;;  %v1149_v44 = vpop.f32.mrf.mxu0  ;;  %vm849_vm9 = vweird.f32 %v1679_v42 }
 0x194   : > { %1680 = vrcp.f32 %v827_v20  ;;  %v1172_v45 = vpop.f32.mrf.mxu1  ;;  %v1203_v51 = vpop.f32.mrf.mxu2  ;;  %vm850_vm11 = vmor %vm848_vm10, %vm849_vm9  ;;  %v1150_v60 = vadd.f32 %v1149_v44, %v1119_v37  ;;  %v882_v10 = vand.u32 2147483647, %v827_v20  ;;  %v884_v59 = vand.u32 2147483648, %v827_v20 }
 0x195   : > { %v845_v15 = vsub.f32 1.0, %v844_v38  ;;  %v1173_v48 = vadd.f32 %v1172_v45, %v1146_v41  ;;  %vm878_vm14 = vweird.f32 %v827_v20  ;;  %v1243_v23 = vadd.f32 %v1242_v9, %v1203_v51 }
 0x196   : > { %vm883_vm0 = vcmp.eq.f32.partialorder %v882_v10, 8.507059e+37 }
 0x197   : > { %v846_v54 = vmul.f32 %v1679_v42, %v845_v15  ;;  %v1369_v31 = vmul.f32 %v1173_v48, %v2256_v6 }
 0x199   : > { %v847_v57 = vadd.f32 %v1679_v42, %v846_v54  ;;  %v2294_v43 = vadd.f32 %v1369_v31, %v2259_v12 }
 0x19a   : > { %v1681_v58 = vpop.eup %1680  ;;  %v1246_v55 = vpop.f32.mrf.mxu3 }
 0x19b   : > { %v851_v39 = vsel %vm850_vm11, %v1679_v42, %v847_v57  ;;  %v874_v63 = vmul.f32 %v1681_v58, %v827_v20  ;;  %v1377_v17 = vsub.f32 0.0, %v2294_v43  ;;  %v1272_v5 = vpop.f32.mrf.mxu0  ;;  %vm879_vm13 = vweird.f32 %v1681_v58 }
 0x19c   : > { %v856_v52 = vsel %vm853_vm12, %v855_v61, %v851_v39  ;;  %v1176_v3 = vpop.f32.mrf.mxu1  ;;  %v1211_v22 = vpop.f32.mrf.mxu2  ;;  %vm880_vm15 = vmor %vm878_vm14, %vm879_vm13  ;;  %v1273_v14 = vadd.f32 %v1272_v5, %v1243_v23 }
 0x19d   : > { %v889_v4 = vmul.f32 %v856_v52, %v2276_v49  ;;  %v875_v36 = vsub.f32 1.0, %v874_v63  ;;  %v1381_v8 = vmul.f32 1.442695, %v1377_v17  ;;  %v1177_v18 = vadd.f32 %v1176_v3, %v1150_v60 }
 0x19e   : > { %v885_v49 = vor.u32 1.1754944e-38, %v884_v59  ;;  %v1247_v35 = vadd.f32 %v1246_v55, %v1211_v22 }
 0x19f   : > { %893 = vst [vmem:[%s2287_s14 + $0x8] sm:$0xff] %v889_v4  ;;  %v876_v11 = vmul.f32 %v1681_v58, %v875_v36  ;;  %1682 = vpow2.f32 %v1381_v8  ;;  %v1371_v19 = vmul.f32 %v1177_v18, %v2265_v56 }
 0x1a1   : > { %v877_v13 = vadd.f32 %v1681_v58, %v876_v11  ;;  %v2301_v24 = vadd.f32 %v1371_v19, %v2268_v21 }
 0x1a2   : > { %v1362_v27 = vpop.f32.mrf.mxu3 }
 0x1a3   : > { %v881_v25 = vsel %vm880_vm15, %v1681_v58, %v877_v13  ;;  %v1379_v26 = vsub.f32 0.0, %v2301_v24  ;;  %v1277_v32 = vpop.f32.mrf.mxu0 }
 0x1a4   : > { %v886_v28 = vsel %vm883_vm0, %v885_v49, %v881_v25  ;;  %v1302_v2 = vpop.f32.mrf.mxu1  ;;  %v1335_v33 = vpop.f32.mrf.mxu2  ;;  %v1278_v47 = vadd.f32 %v1277_v32, %v1247_v35 }
 0x1a5   : > { %v1683_v50 = vpop.eup %1682  ;;  %v891_v29 = vmul.f32 %v886_v28, %v2281_v7  ;;  %v1385_v16 = vmul.f32 1.442695, %v1379_v26  ;;  %v1303_v30 = vadd.f32 %v1302_v2, %v1273_v14 }
 0x1a6   : > { %v1389_v0 = vadd.f32 1.0, %v1683_v50 }
 0x1a7   : > { %895 = vst [vmem:[%s2287_s14 + $0x18] sm:$0xff] %v891_v29  ;;  %1684 = vpow2.f32 %v1385_v16  ;;  %v1336_v34 = vadd.f32 %v1335_v33, %v1303_v30 }
 0x1a8   : > { %1686 = vrcp.f32 %v1389_v0  ;;  %v1402_v54 = vand.u32 2147483647, %v1389_v0  ;;  %vm1398_vm2 = vweird.f32 %v1389_v0 }
 0x1a9   : > { %v1363_v40 = vadd.f32 %v1362_v27, %v1336_v34 }
 0x1aa   : > { %v1366_v45 = vpop.f32.mrf.mxu3  ;;  %vm1403_vm4 = vcmp.eq.f32.partialorder %v1402_v54, 8.507059e+37 }
 0x1ab   : > { %v1370_v62 = vmul.f32 %v1363_v40, %v2256_v6  ;;  %v1404_v6 = vand.u32 2147483648, %v1389_v0 }
 0x1ac   : > { %v1308_v42 = vpop.f32.mrf.mxu1  ;;  %v1339_v41 = vpop.f32.mrf.mxu2 }
 0x1ad   : > { %v1685_v20 = vpop.eup %1684  ;;  %v2308_v38 = vadd.f32 %v1370_v62, %v2259_v12  ;;  %v1309_v7 = vadd.f32 %v1308_v42, %v1278_v47  ;;  %v1405_v61 = vor.u32 1.1754944e-38, %v1404_v6 }
 0x1ae   : > { %v1687_v9 = vpop.eup %1686  ;;  %v1391_v44 = vadd.f32 1.0, %v1685_v20 }
 0x1af   : > { %v1394_v15 = vmul.f32 %v1687_v9, %v1389_v0  ;;  %v1378_v46 = vsub.f32 0.0, %v2308_v38  ;;  %v1340_v48 = vadd.f32 %v1339_v41, %v1309_v7  ;;  %vm1399_vm1 = vweird.f32 %v1687_v9 }
 0x1b0   : > { %1688 = vrcp.f32 %v1391_v44  ;;  %vm1400_vm3 = vmor %vm1398_vm2, %vm1399_vm1  ;;  %v1434_v4 = vand.u32 2147483648, %v1391_v44  ;;  %vm1428_vm6 = vweird.f32 %v1391_v44 }
 0x1b1   : > { %v1395_v51 = vsub.f32 1.0, %v1394_v15  ;;  %v1383_v1 = vmul.f32 1.442695, %v1378_v46  ;;  %v1367_v53 = vadd.f32 %v1366_v45, %v1340_v48 }
 0x1b2   : > { %v1435_v22 = vor.u32 1.1754944e-38, %v1434_v4 }
 0x1b3   : > { %v1396_v31 = vmul.f32 %v1687_v9, %v1395_v51  ;;  %1690 = vpow2.f32 %v1383_v1  ;;  %v1372_v12 = vmul.f32 %v1367_v53, %v2265_v56 }
 0x1b5   : > { %v1397_v57 = vadd.f32 %v1687_v9, %v1396_v31  ;;  %v2313_v37 = vadd.f32 %v1372_v12, %v2268_v21  ;;  %v1432_v21 = vand.u32 2147483647, %v1391_v44 }
 0x1b6   : > { %v1689_v58 = vpop.eup %1688 }
 0x1b7   : > { %v1401_v39 = vsel %vm1400_vm3, %v1687_v9, %v1397_v57  ;;  %v1424_v63 = vmul.f32 %v1689_v58, %v1391_v44  ;;  %v1380_v60 = vsub.f32 0.0, %v2313_v37  ;;  %vm1429_vm5 = vweird.f32 %v1689_v58 }
 0x1b8   : > { %v1406_v17 = vsel %vm1403_vm4, %v1405_v61, %v1401_v39  ;;  %vm1430_vm7 = vmor %vm1428_vm6, %vm1429_vm5  ;;  %vm1433_vm8 = vcmp.eq.f32.partialorder %v1432_v21, 8.507059e+37 }
 0x1b9   : > { %v1691_v52 = vpop.eup %1690  ;;  %v1453_v3 = vmul.f32 %v1406_v17, %v2294_v43  ;;  %v1425_v55 = vsub.f32 1.0, %v1424_v63  ;;  %v1387_v56 = vmul.f32 1.442695, %v1380_v60 }
 0x1ba   : > { %v1390_v36 = vadd.f32 1.0, %v1691_v52 }
 0x1bb   : > { %1566 = vst [vmem:[%s2287_s14 + $0x20] sm:$0xff] %v1453_v3  ;;  %v1426_v8 = vmul.f32 %v1689_v58, %v1425_v55  ;;  %1692 = vpow2.f32 %v1387_v56 }
 0x1bc   : > { %1694 = vrcp.f32 %v1390_v36  ;;  %v1419_v49 = vand.u32 2147483648, %v1390_v36  ;;  %v1417_v26 = vand.u32 2147483647, %v1390_v36  ;;  %vm1413_vm10 = vweird.f32 %v1390_v36 }
 0x1bd   : > { %v1427_v18 = vadd.f32 %v1689_v58, %v1426_v8 }
 0x1be   : > { %v1420_v2 = vor.u32 1.1754944e-38, %v1419_v49  ;;  %vm1418_vm12 = vcmp.eq.f32.partialorder %v1417_v26, 8.507059e+37 }
 0x1bf   : > { %v1431_v10 = vsel %vm1430_vm7, %v1689_v58, %v1427_v18 }
 0x1c0   : > { %v1436_v59 = vsel %vm1433_vm8, %v1435_v22, %v1431_v10 }
 0x1c1   : > { %v1693_v5 = vpop.eup %1692  ;;  %v1455_v43 = vmul.f32 %v1436_v59, %v2301_v24 }
 0x1c2   : > { %v1695_v11 = vpop.eup %1694  ;;  %v1392_v19 = vadd.f32 1.0, %v1693_v5 }
 0x1c3   : > { %1568 = vst [vmem:[%s2287_s14 + $0x30] sm:$0xff] %v1455_v43  ;;  %v1409_v13 = vmul.f32 %v1695_v11, %v1390_v36  ;;  %vm1414_vm9 = vweird.f32 %v1695_v11 }
 0x1c4   : > { %1696 = vrcp.f32 %v1392_v19  ;;  %vm1415_vm11 = vmor %vm1413_vm10, %vm1414_vm9  ;;  %v1449_v30 = vand.u32 2147483648, %v1392_v19  ;;  %v1447_v0 = vand.u32 2147483647, %v1392_v19  ;;  %vm1443_vm14 = vweird.f32 %v1392_v19 }
 0x1c5   : > { %v1410_v23 = vsub.f32 1.0, %v1409_v13 }
 0x1c6   : > { %v1450_v32 = vor.u32 1.1754944e-38, %v1449_v30  ;;  %vm1448_vm0 = vcmp.eq.f32.partialorder %v1447_v0, 8.507059e+37 }
 0x1c7   : > { %v1411_v25 = vmul.f32 %v1695_v11, %v1410_v23 }
 0x1c9   : > { %v1412_v14 = vadd.f32 %v1695_v11, %v1411_v25 }
 0x1ca   : > { %v1697_v28 = vpop.eup %1696 }
 0x1cb   : > { %v1416_v27 = vsel %vm1415_vm11, %v1695_v11, %v1412_v14  ;;  %v1439_v24 = vmul.f32 %v1697_v28, %v1392_v19  ;;  %vm1444_vm13 = vweird.f32 %v1697_v28 }
 0x1cc   : > { %v1421_v50 = vsel %vm1418_vm12, %v1420_v2, %v1416_v27  ;;  %vm1445_vm15 = vmor %vm1443_vm14, %vm1444_vm13 }
 0x1cd   : > { %v1454_v29 = vmul.f32 %v1421_v50, %v2308_v38  ;;  %v1440_v16 = vsub.f32 1.0, %v1439_v24 }
 0x1cf   : > { %1567 = vst [vmem:[%s2287_s14 + $0x28] sm:$0xff] %v1454_v29  ;;  %v1441_v33 = vmul.f32 %v1697_v28, %v1440_v16 }
 0x1d1   : > { %v1442_v34 = vadd.f32 %v1697_v28, %v1441_v33 }
 0x1d3   : > { %v1446_v35 = vsel %vm1445_vm15, %v1697_v28, %v1442_v34 }
 0x1d4   : > { %v1451_v40 = vsel %vm1448_vm0, %v1450_v32, %v1446_v35 }
 0x1d5   : > { %v1456_v47 = vmul.f32 %v1451_v40, %v2313_v37 }
 0x1d7   : > { %1569 = vst [vmem:[%s2287_s14 + $0x38] sm:$0xff] %v1456_v47 }
 0x1d8   : > { %1755 = shalt.err (!%p1752_p4)
}
 0x1d9   : > { %s1799_s18 = smov 256   ;;  %s1800_s14 = smov 16  }
 0x1da   : > { %1582 = dma.vmem_to_hbm [thread:$0]  (%p1886_p11), %s1477_s29, 1024, %s1479_s25, %s1463_s17, %s1799_s18, %s1799_s18, %s1800_s14  }
 0x1db PF: > { %s1493_s28 = sand.u32 1, %s1782_s21   ;;  %p2382_p7 = scmp.ge.s32.totalorder %s1794_s24, 2 }
 0x1dc   : > { %s1494_s15 = scalar_lea.sflag [#allocation4], %s1493_s28 }
 0x1dd   : > { %p1589_p5 = pnand %p2382_p7, %p1890_p12 }
 0x1df   : > { %p1590_p8 = pneg %p1589_p5 }
 0x1e1   : > { %1777 = dma.done.wait (%p1590_p8), %s1494_s15, 1024  }
 0x1e2   : > { %1779 = vsyncadd (%p1590_p8), %s1494_s15, 4294966272  ;;  %p19_p10 = scmp.ge.s32.totalorder %s1861_s27, 4   ;;  %s2383_s21 = smov %s1786_s22 }
 0x1e3   : > { %s2384_s22 = smov %s1790_s23  ;;  %s2385_s23 = smov %s1873_s30 }
 0x1e4   : > { %s2386_s24 = smov %s1861_s27  ;;  %21 = sbr.rel (!%p19_p10) target bundleno = 5 (0x5), region = 91 }
 0x1e9   :  { %1500 = vsyncpa [#allocation3], 1 }
 0x1ea   :  { %1502 = vsyncpa [#allocation3 + $0x1], 1 }
 0x1eb   :  { %1503 = vsyncpa [#allocation4], 1 }
 0x1ec   :  { %1505 = vsyncpa [#allocation4 + $0x1], 1 }

</bundles_post_ra>
